<compile_context>
chip_gen: v7x
topology: tpu7x:2x2x1
jax: 0.10.0
libtpu: 0.0.40
codegen_flags: <defaults>
</compile_context>

<pallas_src>
import math

import jax
import jax.numpy as jnp
import numpy as np
from jax.experimental import pallas as pl
from jax.experimental.pallas import tpu as pltpu

N_QUBITS = 8
N_A_QUBITS = 1
Q_DEPTH = 6
N_STATES = 2 ** N_QUBITS                      # 256
PATCH = 2 ** (N_QUBITS - N_A_QUBITS)          # 128


# ---------------------------------------------------------------------------
# Host-side constant tables (wire 0 is the MSB, PennyLane convention)
# ---------------------------------------------------------------------------
def _bit_table_np():
    j = np.arange(N_STATES)
    return np.stack(
        [(j >> (N_QUBITS - 1 - w)) & 1 for w in range(N_QUBITS)], axis=0
    ).astype(np.int32)                                   # (8, 256)


def _cz_signs_np():
    """Combined +/-1 diagonal of the per-layer CZ chain (all CZs commute)."""
    bits = _bit_table_np()
    signs = np.ones(N_STATES, np.float32)
    for y in range(N_QUBITS - 1):
        signs *= np.where((bits[y] == 1) & (bits[y + 1] == 1), -1.0, 1.0).astype(
            np.float32)
    return signs                                         # (256,)


# ---------------------------------------------------------------------------
# Host-side: fold the 6 variational layers of each generator into U_g^T (256x256)
# ---------------------------------------------------------------------------
def _build_variational_u_t(q_params):
    """q_params: (G, 48).  Returns (G, 256, 256) f32 = transpose of the composed
    variational unitary, so that new_state_rows = state_rows @ U_t."""
    g = q_params.shape[0]
    w = q_params.reshape(g, Q_DEPTH, N_QUBITS).astype(jnp.float32)
    c = jnp.cos(w * 0.5)                                  # (G, 6, 8)
    s = jnp.sin(w * 0.5)
    # RY(theta) = [[c, -s], [s, c]]  -> (G, 6, 8, 2, 2)
    ry = jnp.stack([jnp.stack([c, -s], axis=-1),
                    jnp.stack([s, c], axis=-1)], axis=-2)

    bits = _bit_table_np()                                # (8, 256) int
    row_idx = [jnp.asarray(bits[wq][:, None]) for wq in range(N_QUBITS)]
    col_idx = [jnp.asarray(bits[wq][None, :]) for wq in range(N_QUBITS)]
    cz = jnp.asarray(_cz_signs_np())                      # (256,)

    u = None
    for l in range(Q_DEPTH):
        # layer RY unitary: <i|U|j> = prod_w RY_w[bit_w(i), bit_w(j)]
        layer = None
        for wq in range(N_QUBITS):
            m2 = ry[:, l, wq]                             # (G, 2, 2)
            f = m2[:, row_idx[wq], col_idx[wq]]           # (G, 256, 256)
            layer = f if layer is None else layer * f
        layer = layer * cz[None, :, None]                 # diag(cz) @ layer
        u = layer if u is None else jnp.einsum(
            "gij,gjk->gik", layer, u, precision=jax.lax.Precision.HIGHEST)
    return jnp.swapaxes(u, 1, 2)                          # U^T per generator


# ---------------------------------------------------------------------------
# Pallas kernel: one (generator, batch-tile) block
# ---------------------------------------------------------------------------
def _patch_gen_kernel(nc_ref, ns_ref, bit_ref, u_ref, out_ref):
    # Embedding layer on |0...0> -> product state (lane-only bit table, no iota):
    #   state[r, j] = prod_w ( bit_w(j) ? sin(noise_w/2) : cos(noise_w/2) )
    state = None
    for w in range(N_QUBITS):
        c = nc_ref[:, w:w + 1]                            # (TB, 1)
        s = ns_ref[:, w:w + 1]                            # (TB, 1)
        factor = c + bit_ref[w:w + 1, :] * (s - c)        # (TB, 256)
        state = factor if state is None else state * factor

    # All 6 variational layers (48 RYs + CZ chains) as one MXU matmul.
    state = jnp.dot(state, u_ref[0], preferred_element_type=jnp.float32)

    # qml.probs + partial_measure:  /sum(probs) cancels exactly in p0 / max(p0).
    probs = state * state                                 # (TB, 256)
    p0 = probs[:, :PATCH]                                 # (TB, 128)
    mx = jnp.max(p0, axis=1, keepdims=True)
    out_ref[0] = (p0 * pl.reciprocal(mx, approx=False)).astype(out_ref.dtype)


def _choose_batch_tile(b, g):
    """Batch rows per tile (sublane / MXU-M dim)."""
    cands = [t for t in (256, 128, 64, 32, 16, 8) if b % t == 0]
    if not cands:
        return b                                          # full-dim block is allowed
    if g == 1:
        # keep >= 2 grid steps so a dual-TC chip (v7x) can split the work
        two_step = [t for t in cands if b // t >= 2]
        if two_step:
            return two_step[0]
    return cands[0]


# ---------------------------------------------------------------------------
# Wrapper (parameter prep, pallas_call, output layout)
# ---------------------------------------------------------------------------
def patch_quantum_generator_forward(x, q_params):
    """x: (B, 8) float32 noise angles; q_params: (G, 48) float32 RY angles.
    Returns (B, G*128) float32 — identical layout to the PyTorch module."""
    B = x.shape[0]
    G = q_params.shape[0]

    nc = jnp.cos(x * 0.5).astype(jnp.float32)             # (B, 8)
    ns = jnp.sin(x * 0.5).astype(jnp.float32)
    u_t = _build_variational_u_t(q_params)                # (G, 256, 256)
    bit_tab = jnp.asarray(_bit_table_np().astype(np.float32))  # (8, 256)

    TB = _choose_batch_tile(B, G)
    grid = (G, B // TB)

    out = pl.pallas_call(
        _patch_gen_kernel,
        out_shape=jax.ShapeDtypeStruct((G, B, PATCH), jnp.float32),
        grid=grid,
        in_specs=[
            pl.BlockSpec((TB, N_QUBITS), lambda g, b: (b, 0)),            # noise cos
            pl.BlockSpec((TB, N_QUBITS), lambda g, b: (b, 0)),            # noise sin
            pl.BlockSpec((N_QUBITS, N_STATES), lambda g, b: (0, 0)),      # bit table
            pl.BlockSpec((1, N_STATES, N_STATES), lambda g, b: (g, 0, 0)),  # U_g^T
        ],
        out_specs=pl.BlockSpec((1, TB, PATCH), lambda g, b: (g, b, 0)),
        compiler_params=pltpu.CompilerParams(
            dimension_semantics=("parallel", "parallel")),
    )(nc, ns, bit_tab, u_t)

    # (G, B, 128) -> (B, G*128): images[:, g*128:(g+1)*128] is generator g's patch.
    return jnp.transpose(out, (1, 0, 2)).reshape(B, G * PATCH)


# ---------------------------------------------------------------------------
# Independent pure-JAX reference (tensor-product statevector simulation)
# ---------------------------------------------------------------------------
def _reference_forward(x, q_params):
    w3 = q_params.reshape(-1, Q_DEPTH, N_QUBITS)

    def one(noise, w):
        state = jnp.zeros((2,) * N_QUBITS, jnp.float32).at[(0,) * N_QUBITS].set(1.0)

        def ry(st, theta, wire):
            c = jnp.cos(theta / 2)
            s = jnp.sin(theta / 2)
            st = jnp.moveaxis(st, wire, 0)
            a, b = st[0], st[1]
            st = jnp.stack([c * a - s * b, s * a + c * b], axis=0)
            return jnp.moveaxis(st, 0, wire)

        for i in range(N_QUBITS):
            state = ry(state, noise[i], i)
        for l in range(Q_DEPTH):
            for y in range(N_QUBITS):
                state = ry(state, w[l, y], y)
            for y in range(N_QUBITS - 1):
                st = jnp.moveaxis(state, (y, y + 1), (0, 1))
                st = st.at[1, 1].multiply(-1.0)
                state = jnp.moveaxis(st, (0, 1), (y, y + 1))
        probs = state.reshape(N_STATES) ** 2
        p0 = probs[:PATCH] / jnp.sum(probs)
        return p0 / jnp.max(p0)

    out = jax.vmap(lambda nv: jax.vmap(lambda wg: one(nv, wg))(w3))(x)  # (B, G, 128)
    return out.reshape(x.shape[0], -1)


if __name__ == "__main__":
    key = jax.random.PRNGKey(0)
    k_w, k_x = jax.random.split(key)

    B = 8            # batch of latent noise vectors
    G = 8            # small n_generators for the demo (module default is 128)
    q_delta = 1.0

    # nn.Parameter(q_delta * torch.rand(q_depth * n_qubits)) per generator
    q_params = q_delta * jax.random.uniform(k_w, (G, Q_DEPTH * N_QUBITS),
                                            dtype=jnp.float32)
    # latent noise, one angle per qubit
    x = jax.random.uniform(k_x, (B, N_QUBITS), dtype=jnp.float32) * (math.pi / 2)

    out = patch_quantum_generator_forward(x, q_params)
    out = jax.block_until_ready(out)
    assert out.shape == (B, G * PATCH)

    ref = _reference_forward(x, q_params)
    np.testing.assert_allclose(np.asarray(out), np.asarray(ref),
                               rtol=1e-3, atol=1e-4)
    print("KERNEL_OK")
</pallas_src>

<mosaic_0001>
module attributes {stable_mosaic.version = 11 : i64} {
  func.func @_patch_gen_kernel(%arg0: i32, %arg1: i32, %arg2: memref<8x8xf32, #tpu.memory_space<vmem>>, %arg3: memref<8x8xf32, #tpu.memory_space<vmem>>, %arg4: memref<8x256xf32, #tpu.memory_space<vmem>>, %arg5: memref<1x256x256xf32, #tpu.memory_space<vmem>>, %arg6: memref<1x8x128xf32, #tpu.memory_space<vmem>>) attributes {dimension_semantics = [#tpu.dimension_semantics<parallel>, #tpu.dimension_semantics<parallel>], iteration_bounds = array<i64: 8, 1>, scalar_prefetch = 0 : i64, scratch_operands = 0 : i64, tpu.core_type = #tpu.core_type<tc>, window_params = [{transform_indices = @transform_0, window_bounds = array<i64: 8, 8>}, {transform_indices = @transform_1, window_bounds = array<i64: 8, 8>}, {pipeline_mode = #tpu.pipeline_mode<synchronous>, transform_indices = @transform_2, window_bounds = array<i64: 8, 256>}, {transform_indices = @transform_3, window_bounds = array<i64: 1, 256, 256>}, {transform_indices = @transform_4, window_bounds = array<i64: 1, 8, 128>}]} {
    %c0 = arith.constant 0 : index
    %c0_0 = arith.constant 0 : index
    %0 = vector.load %arg2[%c0, %c0_0] : memref<8x8xf32, #tpu.memory_space<vmem>>, vector<8x1xf32>
    %c0_1 = arith.constant 0 : index
    %c0_2 = arith.constant 0 : index
    %1 = vector.load %arg3[%c0_1, %c0_2] : memref<8x8xf32, #tpu.memory_space<vmem>>, vector<8x1xf32>
    %c0_3 = arith.constant 0 : index
    %c0_4 = arith.constant 0 : index
    %2 = vector.load %arg4[%c0_3, %c0_4] : memref<8x256xf32, #tpu.memory_space<vmem>>, vector<1x256xf32>
    %3 = arith.subf %1, %0 : vector<8x1xf32>
    %4 = vector.broadcast %2 : vector<1x256xf32> to vector<8x256xf32>
    %5 = vector.broadcast %3 : vector<8x1xf32> to vector<8x256xf32>
    %6 = arith.mulf %4, %5 : vector<8x256xf32>
    %7 = vector.broadcast %0 : vector<8x1xf32> to vector<8x256xf32>
    %8 = arith.addf %7, %6 : vector<8x256xf32>
    %c0_5 = arith.constant 0 : index
    %c1 = arith.constant 1 : index
    %9 = vector.load %arg2[%c0_5, %c1] : memref<8x8xf32, #tpu.memory_space<vmem>>, vector<8x1xf32>
    %c0_6 = arith.constant 0 : index
    %c1_7 = arith.constant 1 : index
    %10 = vector.load %arg3[%c0_6, %c1_7] : memref<8x8xf32, #tpu.memory_space<vmem>>, vector<8x1xf32>
    %c1_8 = arith.constant 1 : index
    %c0_9 = arith.constant 0 : index
    %11 = vector.load %arg4[%c1_8, %c0_9] : memref<8x256xf32, #tpu.memory_space<vmem>>, vector<1x256xf32>
    %12 = arith.subf %10, %9 : vector<8x1xf32>
    %13 = vector.broadcast %11 : vector<1x256xf32> to vector<8x256xf32>
    %14 = vector.broadcast %12 : vector<8x1xf32> to vector<8x256xf32>
    %15 = arith.mulf %13, %14 : vector<8x256xf32>
    %16 = vector.broadcast %9 : vector<8x1xf32> to vector<8x256xf32>
    %17 = arith.addf %16, %15 : vector<8x256xf32>
    %18 = arith.mulf %8, %17 : vector<8x256xf32>
    %c0_10 = arith.constant 0 : index
    %c2 = arith.constant 2 : index
    %19 = vector.load %arg2[%c0_10, %c2] : memref<8x8xf32, #tpu.memory_space<vmem>>, vector<8x1xf32>
    %c0_11 = arith.constant 0 : index
    %c2_12 = arith.constant 2 : index
    %20 = vector.load %arg3[%c0_11, %c2_12] : memref<8x8xf32, #tpu.memory_space<vmem>>, vector<8x1xf32>
    %c2_13 = arith.constant 2 : index
    %c0_14 = arith.constant 0 : index
    %21 = vector.load %arg4[%c2_13, %c0_14] : memref<8x256xf32, #tpu.memory_space<vmem>>, vector<1x256xf32>
    %22 = arith.subf %20, %19 : vector<8x1xf32>
    %23 = vector.broadcast %21 : vector<1x256xf32> to vector<8x256xf32>
    %24 = vector.broadcast %22 : vector<8x1xf32> to vector<8x256xf32>
    %25 = arith.mulf %23, %24 : vector<8x256xf32>
    %26 = vector.broadcast %19 : vector<8x1xf32> to vector<8x256xf32>
    %27 = arith.addf %26, %25 : vector<8x256xf32>
    %28 = arith.mulf %18, %27 : vector<8x256xf32>
    %c0_15 = arith.constant 0 : index
    %c3 = arith.constant 3 : index
    %29 = vector.load %arg2[%c0_15, %c3] : memref<8x8xf32, #tpu.memory_space<vmem>>, vector<8x1xf32>
    %c0_16 = arith.constant 0 : index
    %c3_17 = arith.constant 3 : index
    %30 = vector.load %arg3[%c0_16, %c3_17] : memref<8x8xf32, #tpu.memory_space<vmem>>, vector<8x1xf32>
    %c3_18 = arith.constant 3 : index
    %c0_19 = arith.constant 0 : index
    %31 = vector.load %arg4[%c3_18, %c0_19] : memref<8x256xf32, #tpu.memory_space<vmem>>, vector<1x256xf32>
    %32 = arith.subf %30, %29 : vector<8x1xf32>
    %33 = vector.broadcast %31 : vector<1x256xf32> to vector<8x256xf32>
    %34 = vector.broadcast %32 : vector<8x1xf32> to vector<8x256xf32>
    %35 = arith.mulf %33, %34 : vector<8x256xf32>
    %36 = vector.broadcast %29 : vector<8x1xf32> to vector<8x256xf32>
    %37 = arith.addf %36, %35 : vector<8x256xf32>
    %38 = arith.mulf %28, %37 : vector<8x256xf32>
    %c0_20 = arith.constant 0 : index
    %c4 = arith.constant 4 : index
    %39 = vector.load %arg2[%c0_20, %c4] : memref<8x8xf32, #tpu.memory_space<vmem>>, vector<8x1xf32>
    %c0_21 = arith.constant 0 : index
    %c4_22 = arith.constant 4 : index
    %40 = vector.load %arg3[%c0_21, %c4_22] : memref<8x8xf32, #tpu.memory_space<vmem>>, vector<8x1xf32>
    %c4_23 = arith.constant 4 : index
    %c0_24 = arith.constant 0 : index
    %41 = vector.load %arg4[%c4_23, %c0_24] : memref<8x256xf32, #tpu.memory_space<vmem>>, vector<1x256xf32>
    %42 = arith.subf %40, %39 : vector<8x1xf32>
    %43 = vector.broadcast %41 : vector<1x256xf32> to vector<8x256xf32>
    %44 = vector.broadcast %42 : vector<8x1xf32> to vector<8x256xf32>
    %45 = arith.mulf %43, %44 : vector<8x256xf32>
    %46 = vector.broadcast %39 : vector<8x1xf32> to vector<8x256xf32>
    %47 = arith.addf %46, %45 : vector<8x256xf32>
    %48 = arith.mulf %38, %47 : vector<8x256xf32>
    %c0_25 = arith.constant 0 : index
    %c5 = arith.constant 5 : index
    %49 = vector.load %arg2[%c0_25, %c5] : memref<8x8xf32, #tpu.memory_space<vmem>>, vector<8x1xf32>
    %c0_26 = arith.constant 0 : index
    %c5_27 = arith.constant 5 : index
    %50 = vector.load %arg3[%c0_26, %c5_27] : memref<8x8xf32, #tpu.memory_space<vmem>>, vector<8x1xf32>
    %c5_28 = arith.constant 5 : index
    %c0_29 = arith.constant 0 : index
    %51 = vector.load %arg4[%c5_28, %c0_29] : memref<8x256xf32, #tpu.memory_space<vmem>>, vector<1x256xf32>
    %52 = arith.subf %50, %49 : vector<8x1xf32>
    %53 = vector.broadcast %51 : vector<1x256xf32> to vector<8x256xf32>
    %54 = vector.broadcast %52 : vector<8x1xf32> to vector<8x256xf32>
    %55 = arith.mulf %53, %54 : vector<8x256xf32>
    %56 = vector.broadcast %49 : vector<8x1xf32> to vector<8x256xf32>
    %57 = arith.addf %56, %55 : vector<8x256xf32>
    %58 = arith.mulf %48, %57 : vector<8x256xf32>
    %c0_30 = arith.constant 0 : index
    %c6 = arith.constant 6 : index
    %59 = vector.load %arg2[%c0_30, %c6] : memref<8x8xf32, #tpu.memory_space<vmem>>, vector<8x1xf32>
    %c0_31 = arith.constant 0 : index
    %c6_32 = arith.constant 6 : index
    %60 = vector.load %arg3[%c0_31, %c6_32] : memref<8x8xf32, #tpu.memory_space<vmem>>, vector<8x1xf32>
    %c6_33 = arith.constant 6 : index
    %c0_34 = arith.constant 0 : index
    %61 = vector.load %arg4[%c6_33, %c0_34] : memref<8x256xf32, #tpu.memory_space<vmem>>, vector<1x256xf32>
    %62 = arith.subf %60, %59 : vector<8x1xf32>
    %63 = vector.broadcast %61 : vector<1x256xf32> to vector<8x256xf32>
    %64 = vector.broadcast %62 : vector<8x1xf32> to vector<8x256xf32>
    %65 = arith.mulf %63, %64 : vector<8x256xf32>
    %66 = vector.broadcast %59 : vector<8x1xf32> to vector<8x256xf32>
    %67 = arith.addf %66, %65 : vector<8x256xf32>
    %68 = arith.mulf %58, %67 : vector<8x256xf32>
    %c0_35 = arith.constant 0 : index
    %c7 = arith.constant 7 : index
    %69 = vector.load %arg2[%c0_35, %c7] : memref<8x8xf32, #tpu.memory_space<vmem>>, vector<8x1xf32>
    %c0_36 = arith.constant 0 : index
    %c7_37 = arith.constant 7 : index
    %70 = vector.load %arg3[%c0_36, %c7_37] : memref<8x8xf32, #tpu.memory_space<vmem>>, vector<8x1xf32>
    %c7_38 = arith.constant 7 : index
    %c0_39 = arith.constant 0 : index
    %71 = vector.load %arg4[%c7_38, %c0_39] : memref<8x256xf32, #tpu.memory_space<vmem>>, vector<1x256xf32>
    %72 = arith.subf %70, %69 : vector<8x1xf32>
    %73 = vector.broadcast %71 : vector<1x256xf32> to vector<8x256xf32>
    %74 = vector.broadcast %72 : vector<8x1xf32> to vector<8x256xf32>
    %75 = arith.mulf %73, %74 : vector<8x256xf32>
    %76 = vector.broadcast %69 : vector<8x1xf32> to vector<8x256xf32>
    %77 = arith.addf %76, %75 : vector<8x256xf32>
    %78 = arith.mulf %68, %77 : vector<8x256xf32>
    %c0_40 = arith.constant 0 : index
    %c0_41 = arith.constant 0 : index
    %c0_42 = arith.constant 0 : index
    %79 = vector.load %arg5[%c0_40, %c0_41, %c0_42] : memref<1x256x256xf32, #tpu.memory_space<vmem>>, vector<1x256x256xf32>
    %80 = vector.shape_cast %79 : vector<1x256x256xf32> to vector<256x256xf32>
    %cst = arith.constant dense<0.000000e+00> : vector<8x256xf32>
    %81 = tpu.matmul %78, %80, %cst {dimension_numbers = #tpu.dot_dimension_numbers<[1], [0], [0], [1], [0, 0, 1, 1], [], []>} : vector<8x256xf32>, vector<256x256xf32>, vector<8x256xf32> -> vector<8x256xf32>
    %82 = arith.mulf %81, %81 : vector<8x256xf32>
    %83 = vector.extract_strided_slice %82 {offsets = [0, 0], sizes = [8, 128], strides = [1, 1]} : vector<8x256xf32> to vector<8x128xf32>
    %cst_43 = arith.constant dense<0xFF800000> : vector<8xf32>
    %84 = vector.multi_reduction <maximumf>, %83, %cst_43 [1] : vector<8x128xf32> to vector<8xf32>
    %85 = vector.shape_cast %84 : vector<8xf32> to vector<8x1xf32>
    %86 = tpu.reciprocal %85 : vector<8x1xf32> -> vector<8x1xf32>
    %87 = vector.broadcast %86 : vector<8x1xf32> to vector<8x128xf32>
    %88 = arith.mulf %83, %87 : vector<8x128xf32>
    %c0_44 = arith.constant 0 : index
    %c0_45 = arith.constant 0 : index
    %c0_46 = arith.constant 0 : index
    %89 = vector.load %arg6[%c0_44, %c0_45, %c0_46] : memref<1x8x128xf32, #tpu.memory_space<vmem>>, vector<1x8x128xf32>
    %90 = vector.shape_cast %89 : vector<1x8x128xf32> to vector<8x128xf32>
    %91 = vector.shape_cast %88 : vector<8x128xf32> to vector<1x8x128xf32>
    tpu.vector_store %arg6[%c0_44, %c0_45, %c0_46], %91 {strides = array<i32>} : memref<1x8x128xf32, #tpu.memory_space<vmem>>, vector<1x8x128xf32>,
    return
  }
  func.func @transform_0(%arg0: i32, %arg1: i32) -> (i32, i32) {
    %c0_i32 = arith.constant 0 : i32
    %c0_i32_0 = arith.constant 0 : i32
    return %arg1, %c0_i32 : i32, i32
  }
  func.func @transform_1(%arg0: i32, %arg1: i32) -> (i32, i32) {
    %c0_i32 = arith.constant 0 : i32
    %c0_i32_0 = arith.constant 0 : i32
    return %arg1, %c0_i32 : i32, i32
  }
  func.func @transform_2(%arg0: i32, %arg1: i32) -> (i32, i32) {
    %c0_i32 = arith.constant 0 : i32
    %c0_i32_0 = arith.constant 0 : i32
    %c0_i32_1 = arith.constant 0 : i32
    return %c0_i32, %c0_i32_0 : i32, i32
  }
  func.func @transform_3(%arg0: i32, %arg1: i32) -> (i32, i32, i32) {
    %c0_i32 = arith.constant 0 : i32
    %c0_i32_0 = arith.constant 0 : i32
    %c0_i32_1 = arith.constant 0 : i32
    return %arg0, %c0_i32, %c0_i32_0 : i32, i32, i32
  }
  func.func @transform_4(%arg0: i32, %arg1: i32) -> (i32, i32, i32) {
    %c0_i32 = arith.constant 0 : i32
    %c0_i32_0 = arith.constant 0 : i32
    return %arg0, %arg1, %c0_i32 : i32, i32, i32
  }
}

</mosaic_0001>

<bundles_post_ra>
// kernel: tpu_custom_call.1
= control target key start
LH: loop header
LB: loop body
LE: loop exit
PB: predicated region body
PF: predicated region fallthrough
CT: control target
= control target key end

     0   :  { %9 = vsyncpa [#allocation3], 0  ;;  %s1596_s0 = inlined_call_operand.hbm [shape: f32[8,8], index: 0, kind: input, shape index: {}]   ;;  %s1597_s1 = inlined_call_operand.hbm [shape: f32[8,8], index: 1, kind: input, shape index: {}]   ;;  %s1598_s2 = inlined_call_operand.hbm [shape: f32[8,256], index: 2, kind: input, shape index: {}]   ;;  %s1599_s3 = inlined_call_operand.hbm [shape: f32[8,256,256], index: 3, kind: input, shape index: {}]   ;;  %s1600_s4 = inlined_call_operand.hbm [shape: f32[8,8,128], index: 4, kind: output, shape index: {}]  }
   0x1   :  { %10 = vsyncpa [#allocation6], 0 }
   0x2   :  { %11 = vsyncpa [#allocation9], 0 }
   0x3   :  { %13 = vsyncpa [#allocation9 + $0x1], 0 }
   0x4   :  { %14 = vsyncpa [#allocation4], 0 }
   0x5   :  { %16 = vsyncpa [#allocation4 + $0x1], 0  ;;  %s1219_s15 = smov 0   ;;  %s1221_s16 = smov 0  }
   0x6   :  { %s1223_s17 = smov 0   ;;  %s1225_s18 = smov 0  }
   0x7   :  { %s1227_s19 = smov 0   ;;  %s1229_s20 = smov 0  }
   0x8 LB: > { %s769_s21 = sadd.s32 4294967295, %s1177_s20   ;;  %s770_s22 = sadd.s32 4294967294, %s1177_s20   ;;  %s1177_s20 = sphi %s1229_s20, %s22_s20   ;;  %s1173_s19 = sphi %s1227_s19, %s1623_s19   ;;  %s1169_s18 = sphi %s1225_s18, %s1622_s18   ;;  %s1165_s17 = sphi %s1223_s17, %s1621_s17   ;;  %s1161_s16 = sphi %s1221_s16, %s1620_s16   ;;  %s1157_s15 = sphi %s1219_s15, %s1619_s15  }
   0x9   : > { %p127_p0 = scmp.ne.s32.totalorder %s1161_s16, %s1157_s15  ;;  %p1253_p1 = scmp.eq.s32.totalorder %s769_s21, 0 }
   0xa   : > { %p1257_p2 = scmp.eq.s32.totalorder %s769_s21, 7  ;;  %p159_p3 = scmp.eq.s32.totalorder %s770_s22, 7 }
   0xb   : > { %s1605_s23 = scalar_select %p1253_p1, 1, 0 }
   0xc   : > { %s1606_s24 = scalar_select %p1257_p2, 1, 0 }
   0xd   : > { %p1263_p4 = por %p1253_p1, %p127_p0  ;;  %p771_p5 = scmp.ge.s32.totalorder %s1177_s20, 1 }
   0xe   : > { %p1268_p6 = por %p159_p3, %p127_p0  ;;  %p166_p7 = scmp.lt.s32.totalorder %s1177_s20, 9 }
   0xf   : > { %s1607_s25 = scalar_select %p1263_p4, 1, 0 }
  0x10   : > { %s1608_s26 = scalar_select %p1268_p6, 1, 0 }
  0x11   : > { %p1273_p8 = pnand %p771_p5, %p166_p7  ;;  %s1179_s28 = smov [#allocation5]  }
  0x12   : > { %s194_s29 = sshll.u32 %s1179_s28, 4  ;;  %s1180_s5 = smov [#allocation2]   ;;  %s195_s29 = int_to_ptr.vmem [resolvable:$true] %s194_s29 }
  0x13   : > { %s1609_s27 = scalar_select %p1273_p8, 1, 0 }
  0x14   : > { %p870_p9 = pneg %p1273_p8  ;;  %s181_s6 = sshll.u32 %s1180_s5, 4  ;;  %s1285_s6 = int_to_ptr.vmem [resolvable:$true] %s181_s6 }
  0x15   : > { %s1181_s7 = smov [#allocation7]   ;;  %s973_s11 = scalar_lea.hbm %s1597_s1, 128 }
  0x16   : > { %p1281_p10 = pnand %p870_p9, %p1253_p1  ;;  %s1287_s8 = sshll.u32 %s1181_s7, 4  ;;  %s206_s8 = int_to_ptr.vmem [resolvable:$true] %s1287_s8 }
  0x17   : > { %p974_p11 = scmp.ne.s32.totalorder %s1597_s1, %s973_s11  ;;  %p980_p3 = scmp.lt.u32.totalorder %s973_s11, %s1597_s1 }
  0x18   : > { %p1297_p12 = pneg %p1281_p10 }
  0x1a   : > { %p976_p13 = pnand %p1297_p12, %p974_p11 }
  0x1c   : > { %p977_p0 = pneg %p976_p13 }
  0x1e   : > { %p982_p5 = pnand %p980_p3, %p977_p0 }
  0x20   : > { %985 = shalt.err (!%p982_p5)
}
  0x21   : > { %s986_s28 = scalar_lea.vmem %s195_s29, 128  ;;  %p994_p4 = scmp.lt.s32.totalorder %s195_s29, %s195_s29 }
  0x22   : > { %p987_p7 = scmp.ne.s32.totalorder %s195_s29, %s986_s28  ;;  %p995_p1 = scmp.lt.s32.totalorder %s986_s28, %s986_s28 }
  0x24   : > { %p989_p9 = pnand %p987_p7, %p1297_p12  ;;  %p996_p8 = por %p995_p1, %p994_p4 }
  0x26   : > { %p990_p6 = pneg %p989_p9 }
  0x28   : > { %p997_p2 = pnand %p996_p8, %p990_p6 }
  0x2a   : > { %1000 = shalt.err (!%p997_p2)
}
  0x2b   : > { %876 = dma.hbm_to_vmem [thread:$0]  (!%p1281_p10), %s1597_s1, 128, %s195_s29, [#allocation6]  }
  0x2c   : > { %s1001_s11 = scalar_lea.hbm %s1596_s0, 128 }
  0x2d   : > { %p1002_p11 = scmp.ne.s32.totalorder %s1596_s0, %s1001_s11  ;;  %p1008_p2 = scmp.lt.u32.totalorder %s1001_s11, %s1596_s0 }
  0x2f   : > { %p1004_p13 = pnand %p1002_p11, %p1297_p12 }
  0x31   : > { %p1005_p1 = pneg %p1004_p13 }
  0x33   : > { %p1010_p4 = pnand %p1008_p2, %p1005_p1 }
  0x35   : > { %1013 = shalt.err (!%p1010_p4)
}
  0x36   : > { %s1014_s29 = scalar_lea.vmem %s1285_s6, 128  ;;  %p1022_p3 = scmp.lt.s32.totalorder %s1285_s6, %s1285_s6 }
  0x37   : > { %p1015_p6 = scmp.ne.s32.totalorder %s1285_s6, %s1014_s29  ;;  %p1023_p5 = scmp.lt.s32.totalorder %s1014_s29, %s1014_s29 }
  0x39   : > { %p1017_p8 = pnand %p1015_p6, %p1297_p12  ;;  %p1024_p7 = por %p1023_p5, %p1022_p3 }
  0x3b   : > { %p1018_p0 = pneg %p1017_p8 }
  0x3d   : > { %p1025_p9 = pnand %p1024_p7, %p1018_p0 }
  0x3f   : > { %1028 = shalt.err (!%p1025_p9)
}
  0x40   : > { %873 = dma.hbm_to_vmem [thread:$0]  (!%p1281_p10), %s1596_s0, 128, %s1285_s6, [#allocation3]  }
  0x41   : > { %s1029_s10 = scalar_lea.hbm %s1598_s2, 256 }
  0x42   : > { %p1030_p11 = scmp.ne.s32.totalorder %s1598_s2, %s1029_s10  ;;  %p1036_p2 = scmp.lt.u32.totalorder %s1029_s10, %s1598_s2 }
  0x44   : > { %p1032_p13 = pnand %p1030_p11, %p1297_p12 }
  0x46   : > { %p1033_p1 = pneg %p1032_p13 }
  0x48   : > { %p1038_p4 = pnand %p1036_p2, %p1033_p1 }
  0x4a   : > { %1041 = shalt.err (!%p1038_p4)
}
  0x4b   : > { %s1042_s22 = scalar_lea.vmem %s206_s8, 256  ;;  %p1050_p3 = scmp.lt.s32.totalorder %s206_s8, %s206_s8 }
  0x4c   : > { %p1043_p6 = scmp.ne.s32.totalorder %s206_s8, %s1042_s22  ;;  %p1051_p5 = scmp.lt.s32.totalorder %s1042_s22, %s1042_s22 }
  0x4e   : > { %p1045_p8 = pnand %p1043_p6, %p1297_p12  ;;  %p1052_p7 = por %p1051_p5, %p1050_p3 }
  0x50   : > { %p1046_p0 = pneg %p1045_p8 }
  0x52   : > { %p1053_p9 = pnand %p1052_p7, %p1046_p0 }
  0x54   : > { %1056 = shalt.err (!%p1053_p9)
}
  0x55   : > { %879 = dma.hbm_to_vmem [thread:$0]  (!%p1281_p10), %s1598_s2, 256, %s206_s8, [#allocation6]  }
  0x56   : > { %s114_s14 = sadd.s32 1, %s1165_s17  ;;  %s34_s28 = sadd.s32 1, %s1173_s19 }
  0x57   : > { %p121_p12 = scmp.ne.s32.totalorder %s1165_s17, %s1161_s16  ;;  %p36_p11 = scmp.ge.s32.totalorder %s34_s28, 8 }
  0x58   : > { %p122_p13 = scmp.eq.s32.totalorder %s1177_s20, 0  ;;  %p1612_p1 = scmp.ne.s32.totalorder %s1606_s24, 0 }
  0x59   : > { %p891_p4 = scmp.lt.s32.totalorder %s1177_s20, 8  ;;  %s1625_s28 = smov (%p36_p11, %s34_s28), 0 }
  0x5a   : > { %p1362_p2 = por %p1612_p1, %p121_p12  ;;  %p123_p6 = por %p122_p13, %p121_p12 }
  0x5b   : > { %s216_s5 = sand.u32 1, %s1165_s17   ;;  %s111_s7 = ssub.s32 %s1173_s19, %s1625_s28 }
  0x5c   : > { %p112_p8 = scmp.eq.s32.totalorder %s111_s7, 0  ;;  %s776_s8 = sshll.u32 %s216_s5, 9 }
  0x5d   : > { %s789_s9 = sshll.u32 %s1173_s19, 13  ;;  %s220_s13 = scalar_lea.vmem [#allocation8], %s776_s8 }
  0x5e   : > { %s1374_s10 = scalar_select %p112_p8, %s1165_s17, %s114_s14  }
  0x5f   : > { %s1379_s24 = scalar_lea.hbm %s1599_s3, %s789_s9  ;;  %s227_s21 = sshll.u32 %s220_s13, 4  ;;  %s1381_s21 = int_to_ptr.vmem [resolvable:$true] %s227_s21 }
  0x60   : > { %p1385_p10 = pnand %p891_p4, %p123_p6  ;;  %s1389_s6 = scalar_lea.sflag [#allocation9], %s216_s5 }
  0x61   : > { %s1057_s29 = scalar_lea.hbm %s1379_s24, 8192  ;;  %s1062_s8 = scalar_lea.hbm %s1599_s3, 65536 }
  0x62   : > { %p1058_p0 = scmp.ne.s32.totalorder %s1379_s24, %s1057_s29  ;;  %p1059_p3 = pneg %p1385_p10 }
  0x63   : > { %p1063_p9 = scmp.lt.u32.totalorder %s1379_s24, %s1599_s3  ;;  %p1064_p12 = scmp.lt.u32.totalorder %s1062_s8, %s1057_s29 }
  0x64   : > { %p1060_p5 = pnand %p1059_p3, %p1058_p0  ;;  %p1066_p13 = scmp.lt.u32.totalorder %s1057_s29, %s1379_s24 }
  0x65   : > { %p1065_p11 = por %p1064_p12, %p1063_p9 }
  0x66   : > { %p1061_p7 = pneg %p1060_p5 }
  0x67   : > { %p1067_p1 = por %p1066_p13, %p1065_p11 }
  0x69   : > { %p1068_p4 = pnand %p1067_p1, %p1061_p7 }
  0x6b   : > { %1071 = shalt.err (!%p1068_p4)
}
  0x6c   : > { %s1072_s5 = scalar_lea.vmem %s1381_s21, 8192  ;;  %s1182_s12 = smov [#allocation8]  }
  0x6d   : > { %p1073_p6 = scmp.ne.s32.totalorder %s1381_s21, %s1072_s5  ;;  %s1077_s13 = sshll.u32 %s1182_s12, 4  ;;  %s1078_s13 = int_to_ptr.vmem [resolvable:$false] %s1077_s13 }
  0x6e   : > { %s1079_s14 = scalar_lea.vmem %s1078_s13, 16384  ;;  %p1080_p5 = scmp.lt.s32.totalorder %s1381_s21, %s1078_s13 }
  0x6f   : > { %p1075_p8 = pnand %p1073_p6, %p1059_p3  ;;  %p1081_p9 = scmp.lt.s32.totalorder %s1079_s14, %s1072_s5 }
  0x71   : > { %p1076_p0 = pneg %p1075_p8  ;;  %p1082_p12 = por %p1081_p9, %p1080_p5 }
  0x73   : > { %p1083_p11 = pnand %p1082_p12, %p1076_p0 }
  0x75   : > { %1086 = shalt.err (!%p1083_p11)
}
  0x76   : > { %s1183_s29 = smov 256   ;;  %s1184_s7 = smov 16  }
  0x77   : > { %883 = dma.hbm_to_vmem [thread:$0]  (!%p1385_p10), %s1379_s24, 8192, %s1381_s21, %s1389_s6, %s1183_s29, %s1183_s29, %s1184_s7  }
  0x78   : > { %p1615_p3 = scmp.ne.s32.totalorder %s1609_s27, 0 }
  0x79   : > { %p1616_p7 = scmp.ne.s32.totalorder (!%p1615_p3), %s1605_s23, 0 }
  0x7a   : > { %239 = sbr.rel (%p1615_p3) target bundleno = 697 (0x2b9), region = 36 }
  0x81   : > { %1140 = dma.done.wait (%p1616_p7), [#allocation3], 128  }
  0x82   : > { %1142 = vsyncadd (%p1616_p7), [#allocation3], 4294967168 }
  0x83   : > { %1144 = dma.done.wait (%p1616_p7), [#allocation6], 384  }
  0x84   : > { %1146 = vsyncadd (%p1616_p7), [#allocation6], 4294966912  ;;  %s1428_s8 = sand.u32 1, %s1161_s16   ;;  %p1617_p10 = scmp.ne.s32.totalorder %s1607_s25, 0 }
  0x85   : > { %s783_s27 = sshll.u32 %s1428_s8, 9  ;;  %s254_s24 = scalar_lea.sflag [#allocation9], %s1428_s8 }
  0x86   : > { %s1432_s21 = scalar_lea.vmem [#allocation8], %s783_s27 }
  0x87   : > { %1148 = dma.done.wait (%p1617_p10), %s254_s24, 8192  }
  0x88   : > { %1150 = vsyncadd (%p1617_p10), %s254_s24, 4294959104  ;;  %v1185_v0 = vmov 0   ;;  %v1438_v1 = vld [vmem:[#allocation2] sm:$0xff]  ;;  %v283_v2 = vld [vmem:[#allocation5] sm:$0xff]  ;;  %v1186_v17 = vmov 1   ;;  %v1187_v25 = vmov 2  }
  0x89   : > { %957 = vset.pattern.permute.xlu1 %v1185_v0  ;;  %959 = vset.pattern.permute.xlu0 %v1185_v0  ;;  %v501_v3 = vld [vmem:[%s1432_s21 + $0x8] sm:$0xff]  ;;  %v1443_v4 = vsub.f32 %v283_v2, %v1438_v1  ;;  %v503_v5 = vld [vmem:[%s1432_s21 + $0x18] sm:$0xff]  ;;  %v500_v6 = vld [vmem:[%s1432_s21] sm:$0xff]  ;;  %v1188_v35 = vmov 3   ;;  %v1189_v38 = vmov 4   ;;  %v1190_v46 = vmov 5  }
  0x8a   : > { %306 = vperm.xlu1 %957, %v1438_v1   ;;  %v502_v7 = vld [vmem:[%s1432_s21 + $0x10] sm:$0xff]  ;;  %v790_v8 = vpack.c.bf16 %v503_v5, %v501_v3  ;;  %v505_v10 = vld [vmem:[%s1432_s21 + $0x28] sm:$0xff]  ;;  %v507_v11 = vld [vmem:[%s1432_s21 + $0x38] sm:$0xff]  ;;  %v1191_v56 = vmov 7   ;;  %v1192_v3 = vmov 6   ;;  %s784_s23 = sshll.u32 %s1428_s8, 3 }
  0x8b   : > { %v792_v9 = vpack.c.bf16 %v502_v7, %v500_v6  ;;  %v504_v12 = vld [vmem:[%s1432_s21 + $0x20] sm:$0xff]  ;;  %299 = vperm.xlu0 %959, %v1443_v4   ;;  %v794_v13 = vpack.c.bf16 %v507_v11, %v505_v10  ;;  %v506_v14 = vld [vmem:[%s1432_s21 + $0x30] sm:$0xff]  ;;  %v509_v15 = vld [vmem:[%s1432_s21 + $0x48] sm:$0xff]  ;;  %s786_s25 = sshll.u32 %s1169_s18, 7  ;;  %s281_s22 = scalar_lea.vmem [#allocation10], %s784_s23 }
  0x8c   : > { %v511_v16 = vld [vmem:[%s1432_s21 + $0x58] sm:$0xff]  ;;  %791 = vmatprep.subr.bf16.mxu0 %v790_v8  ;;  %v796_v18 = vpack.c.bf16 %v506_v14, %v504_v12  ;;  %v508_v20 = vld [vmem:[%s1432_s21 + $0x40] sm:$0xff]  ;;  %v510_v21 = vld [vmem:[%s1432_s21 + $0x50] sm:$0xff]  ;;  %s655_s6 = sshll.u32 %s281_s22, 4  ;;  %s1548_s5 = scalar_lea.hbm %s1600_s4, %s786_s25  ;;  %s1550_s6 = int_to_ptr.vmem [resolvable:$true] %s655_s6 }
  0x8d   : > { %793 = vmatpush1.bf16.msra.mxu0 %v792_v9  ;;  %v798_v19 = vpack.c.bf16 %v511_v16, %v509_v15  ;;  %v513_v22 = vld [vmem:[%s1432_s21 + $0x68] sm:$0xff]  ;;  %v515_v23 = vld [vmem:[%s1432_s21 + $0x78] sm:$0xff]  ;;  %v800_v24 = vpack.c.bf16 %v510_v21, %v508_v20  ;;  %v512_v27 = vld [vmem:[%s1432_s21 + $0x60] sm:$0xff]  ;;  %s641_s12 = scalar_lea.sflag [#allocation4], %s1428_s8  ;;  %s1087_s13 = scalar_lea.vmem %s1550_s6, 128 }
  0x8e   : > { %958 = vset.pattern.permute.xlu1 %v1186_v17  ;;  %795 = vmatprep.subr.bf16.mxu0 %v794_v13  ;;  %v802_v26 = vpack.c.bf16 %v515_v23, %v513_v22  ;;  %v514_v28 = vld [vmem:[%s1432_s21 + $0x70] sm:$0xff]  ;;  %v517_v29 = vld [vmem:[%s1432_s21 + $0x88] sm:$0xff]  ;;  %v519_v30 = vld [vmem:[%s1432_s21 + $0x98] sm:$0xff]  ;;  %p1088_p13 = scmp.ne.s32.totalorder %s1550_s6, %s1087_s13  ;;  %s1193_s18 = smov [#allocation10]  }
  0x8f   : > { %331 = vperm.xlu1 %958, %v1438_v1   ;;  %960 = vset.pattern.permute.xlu0 %v1186_v17  ;;  %v804_v31 = vpack.c.bf16 %v514_v28, %v512_v27  ;;  %v806_v32 = vpack.c.bf16 %v519_v30, %v517_v29  ;;  %v516_v33 = vld [vmem:[%s1432_s21 + $0x80] sm:$0xff]  ;;  %v518_v34 = vld [vmem:[%s1432_s21 + $0x90] sm:$0xff]  ;;  %v521_v36 = vld [vmem:[%s1432_s21 + $0xa8] sm:$0xff]  ;;  %s1091_s14 = sshll.u32 %s1193_s18, 4  ;;  %s1092_s14 = int_to_ptr.vmem [resolvable:$false] %s1091_s14 }
  0x90   : > { %325 = vperm.xlu0 %960, %v1443_v4   ;;  %v523_v37 = vld [vmem:[%s1432_s21 + $0xb8] sm:$0xff]  ;;  %v808_v39 = vpack.c.bf16 %v518_v34, %v516_v33  ;;  %v520_v41 = vld [vmem:[%s1432_s21 + $0xa0] sm:$0xff]  ;;  %v522_v42 = vld [vmem:[%s1432_s21 + $0xb0] sm:$0xff]  ;;  %p1089_p1 = pnand %p1088_p13, %p1362_p2  ;;  %s1093_s29 = scalar_lea.vmem %s1092_s14, 256 }
  0x91   : > { %797 = vmatpush1.bf16.msra.mxu0 %v796_v18  ;;  %v810_v40 = vpack.c.bf16 %v523_v37, %v521_v36  ;;  %v525_v43 = vld [vmem:[%s1432_s21 + $0xc8] sm:$0xff]  ;;  %v527_v44 = vld [vmem:[%s1432_s21 + $0xd8] sm:$0xff]  ;;  %v812_v45 = vpack.c.bf16 %v522_v42, %v520_v41  ;;  %v524_v48 = vld [vmem:[%s1432_s21 + $0xc0] sm:$0xff]  ;;  %p1094_p6 = scmp.lt.s32.totalorder %s1550_s6, %s1092_s14  ;;  %p1095_p8 = scmp.lt.s32.totalorder %s1093_s29, %s1087_s13 }
  0x92   : > { %799 = vmatprep.subr.bf16.mxu0 %v798_v19  ;;  %v814_v47 = vpack.c.bf16 %v527_v44, %v525_v43  ;;  %v526_v49 = vld [vmem:[%s1432_s21 + $0xd0] sm:$0xff]  ;;  %v529_v50 = vld [vmem:[%s1432_s21 + $0xe8] sm:$0xff]  ;;  %v531_v51 = vld [vmem:[%s1432_s21 + $0xf8] sm:$0xff]  ;;  %p1090_p4 = pneg %p1089_p1 }
  0x93   : > { %962 = vset.pattern.permute.xlu1 %v1187_v25  ;;  %v816_v52 = vpack.c.bf16 %v526_v49, %v524_v48  ;;  %v818_v53 = vpack.c.bf16 %v531_v51, %v529_v50  ;;  %v528_v54 = vld [vmem:[%s1432_s21 + $0xe0] sm:$0xff]  ;;  %v530_v55 = vld [vmem:[%s1432_s21 + $0xf0] sm:$0xff]  ;;  %v533_v57 = vld [vmem:[%s1432_s21 + $0x108] sm:$0xff]  ;;  %p1096_p0 = por %p1095_p8, %p1094_p6 }
  0x94   : > { %352 = vperm.xlu1 %962, %v1443_v4   ;;  %961 = vset.pattern.permute.xlu0 %v1187_v25  ;;  %v535_v58 = vld [vmem:[%s1432_s21 + $0x118] sm:$0xff]  ;;  %v820_v59 = vpack.c.bf16 %v530_v55, %v528_v54  ;;  %v532_v61 = vld [vmem:[%s1432_s21 + $0x100] sm:$0xff]  ;;  %v534_v62 = vld [vmem:[%s1432_s21 + $0x110] sm:$0xff] }
  0x95   : > { %358 = vperm.xlu0 %961, %v1438_v1   ;;  %801 = vmatpush1.bf16.msra.mxu0 %v800_v24  ;;  %v822_v60 = vpack.c.bf16 %v535_v58, %v533_v57  ;;  %v537_v63 = vld [vmem:[%s1432_s21 + $0x128] sm:$0xff]  ;;  %v539_v0 = vld [vmem:[%s1432_s21 + $0x138] sm:$0xff]  ;;  %v824_v2 = vpack.c.bf16 %v534_v62, %v532_v61  ;;  %v536_v6 = vld [vmem:[%s1432_s21 + $0x120] sm:$0xff]  ;;  %p1097_p5 = pnand %p1096_p0, %p1090_p4 }
  0x96   : > { %803 = vmatprep.subr.bf16.mxu0 %v802_v26  ;;  %v826_v5 = vpack.c.bf16 %v539_v0, %v537_v63  ;;  %v538_v7 = vld [vmem:[%s1432_s21 + $0x130] sm:$0xff]  ;;  %v541_v8 = vld [vmem:[%s1432_s21 + $0x148] sm:$0xff]  ;;  %v543_v9 = vld [vmem:[%s1432_s21 + $0x158] sm:$0xff] }
  0x97   : > { %v828_v10 = vpack.c.bf16 %v538_v7, %v536_v6  ;;  %v830_v11 = vpack.c.bf16 %v543_v9, %v541_v8  ;;  %v540_v12 = vld [vmem:[%s1432_s21 + $0x140] sm:$0xff]  ;;  %v542_v13 = vld [vmem:[%s1432_s21 + $0x150] sm:$0xff]  ;;  %v545_v14 = vld [vmem:[%s1432_s21 + $0x168] sm:$0xff] }
  0x98   : > { %963 = vset.pattern.permute.xlu1 %v1188_v35  ;;  %v547_v15 = vld [vmem:[%s1432_s21 + $0x178] sm:$0xff]  ;;  %v544_v17 = vld [vmem:[%s1432_s21 + $0x160] sm:$0xff]  ;;  %v546_v18 = vld [vmem:[%s1432_s21 + $0x170] sm:$0xff] }
  0x99   : > { %379 = vperm.xlu1 %963, %v1443_v4   ;;  %964 = vset.pattern.permute.xlu0 %v1189_v38  ;;  %v834_v16 = vpack.c.bf16 %v547_v15, %v545_v14  ;;  %v549_v19 = vld [vmem:[%s1432_s21 + $0x188] sm:$0xff]  ;;  %v551_v20 = vld [vmem:[%s1432_s21 + $0x198] sm:$0xff]  ;;  %v836_v21 = vpack.c.bf16 %v546_v18, %v544_v17  ;;  %v548_v23 = vld [vmem:[%s1432_s21 + $0x180] sm:$0xff] }
  0x9a   : > { %805 = vmatpush1.bf16.msra.mxu0 %v804_v31  ;;  %406 = vperm.xlu0 %964, %v1443_v4   ;;  %v838_v22 = vpack.c.bf16 %v551_v20, %v549_v19  ;;  %v550_v24 = vld [vmem:[%s1432_s21 + $0x190] sm:$0xff]  ;;  %v553_v25 = vld [vmem:[%s1432_s21 + $0x1a8] sm:$0xff]  ;;  %v555_v26 = vld [vmem:[%s1432_s21 + $0x1b8] sm:$0xff] }
  0x9b   : > { %807 = vmatprep.subr.bf16.mxu0 %v806_v32  ;;  %v840_v27 = vpack.c.bf16 %v550_v24, %v548_v23  ;;  %v842_v28 = vpack.c.bf16 %v555_v26, %v553_v25  ;;  %v552_v29 = vld [vmem:[%s1432_s21 + $0x1a0] sm:$0xff]  ;;  %v557_v30 = vld [vmem:[%s1432_s21 + $0x1c8] sm:$0xff]  ;;  %v559_v31 = vld [vmem:[%s1432_s21 + $0x1d8] sm:$0xff] }
  0x9c   : > { %v846_v33 = vpack.c.bf16 %v559_v31, %v557_v30  ;;  %v556_v34 = vld [vmem:[%s1432_s21 + $0x1c0] sm:$0xff]  ;;  %v558_v35 = vld [vmem:[%s1432_s21 + $0x1d0] sm:$0xff]  ;;  %v561_v36 = vld [vmem:[%s1432_s21 + $0x1e8] sm:$0xff] }
  0x9d   : > { %385 = vperm.xlu1 %963, %v1438_v1   ;;  %v563_v37 = vld [vmem:[%s1432_s21 + $0x1f8] sm:$0xff]  ;;  %v562_v41 = vld [vmem:[%s1432_s21 + $0x1f0] sm:$0xff] }
  0x9e   : > { %809 = vmatpush1.bf16.msra.mxu0 %v808_v39  ;;  %967 = vset.pattern.permute.xlu0 %v1190_v46  ;;  %v850_v39 = vpack.c.bf16 %v563_v37, %v561_v36  ;;  %v312_v49 = vld [vmem:[#allocation7 + $0x1] ss:$8 sm:$0x3]  ;;  %v339_v57 = vld [vmem:[#allocation7 + $0x2] ss:$8 sm:$0x3] }
  0x9f   : > { %811 = vmatprep.subr.bf16.mxu0 %v810_v40  ;;  %439 = vperm.xlu0 %967, %v1438_v1   ;;  %v560_v40 = vld [vmem:[%s1432_s21 + $0x1e0] sm:$0xff]  ;;  %v366_v6 = vld [vmem:[#allocation7 + $0x3] ss:$8 sm:$0x3] }
  0xa0   : > { %v852_v42 = vpack.c.bf16 %v562_v41, %v560_v40  ;;  %v393_v7 = vld [vmem:[#allocation7 + $0x4] ss:$8 sm:$0x3]  ;;  %v447_v30 = vld [vmem:[#allocation7 + $0x6] ss:$8 sm:$0x3] }
  0xa1   : > { %965 = vset.pattern.permute.xlu1 %v1189_v38  ;;  %v848_v38 = vpack.c.bf16 %v558_v35, %v556_v34  ;;  %v474_v34 = vld [vmem:[#allocation7 + $0x7] ss:$8 sm:$0x3] }
  0xa2   : > { %412 = vperm.xlu1 %965, %v1438_v1   ;;  %813 = vmatpush1.bf16.msra.mxu0 %v812_v45  ;;  %v287_v45 = vlaneseq }
  0xa3   : > { %815 = vmatprep.subr.bf16.mxu0 %v814_v47  ;;  %969 = vset.pattern.permute.xlu0 %v1191_v56 }
  0xa4   : > { %487 = vperm.xlu0 %969, %v1443_v4   ;;  %v288_v47 = vshrl.u32 %v287_v45, 7 }
  0xa6   : > { %966 = vset.pattern.permute.xlu1 %v1190_v46  ;;  %817 = vmatpush1.bf16.msra.mxu0 %v816_v52  ;;  %v1523_v51 = vsub.s32 0, %v288_v47  ;;  %v1525_v52 = vsub.s32 1, %v288_v47 }
  0xa7   : > { %433 = vperm.xlu1 %966, %v1443_v4   ;;  %819 = vmatprep.subr.bf16.mxu0 %v818_v53  ;;  %v284_v53 = vld [vmem:[#allocation7] ss:$8 sm:$0x3] }
  0xa8   : > { %v317_v54 = vrot.slane %v312_v49, %v1523_v51  ;;  %v321_v55 = vrot.slane %v312_v49, %v1525_v52  ;;  %v344_v63 = vrot.slane %v339_v57, %v1523_v51  ;;  %v348_v0 = vrot.slane %v339_v57, %v1525_v52 }
  0xa9   : > { %v371_v14 = vrot.slane %v366_v6, %v1523_v51  ;;  %v375_v15 = vrot.slane %v366_v6, %v1525_v52  ;;  %v452_v37 = vrot.slane %v447_v30, %v1523_v51  ;;  %v483_v45 = vrot.slane %v474_v34, %v1525_v52 }
  0xaa   : > { %821 = vmatpush1.bf16.msra.mxu0 %v820_v59  ;;  %v290_v59 = vrot.slane %v284_v53, %v1523_v51 }
  0xab   : > { %968 = vset.pattern.permute.xlu1 %v1192_v3  ;;  %823 = vmatprep.subr.bf16.mxu0 %v822_v60  ;;  %v294_v60 = vrot.slane %v284_v53, %v1525_v52 }
  0xac   : > { %460 = vperm.xlu1 %968, %v1443_v4   ;;  %v832_v4 = vpack.c.bf16 %v542_v13, %v540_v12  ;;  %v420_v13 = vld [vmem:[#allocation7 + $0x5] ss:$8 sm:$0x3] }
  0xad   : > { %v425_v20 = vrot.slane %v420_v13, %v1523_v51 }
  0xae   : > { %825 = vmatpush1.bf16.msra.mxu0 %v824_v2 }
  0xaf   : > { %827 = vmatprep.subr.bf16.mxu0 %v826_v5 }
  0xb0   : > { %466 = vperm.xlu1 %968, %v1438_v1  }
  0xb2   : > { %829 = vmatpush1.bf16.msra.mxu0 %v828_v10 }
  0xb3   : > { %831 = vmatprep.subr.bf16.mxu0 %v830_v11 }
  0xb4   : > { %970 = vset.pattern.permute.xlu1 %v1191_v56 }
  0xb5   : > { %493 = vperm.xlu1 %970, %v1438_v1   ;;  %v554_v1 = vld [vmem:[%s1432_s21 + $0x1b0] sm:$0xff] }
  0xb6   : > { %833 = vmatpush1.bf16.msra.mxu0 %v832_v4  ;;  %v844_v32 = vpack.c.bf16 %v554_v1, %v552_v29  ;;  %v398_v4 = vrot.slane %v393_v7, %v1523_v51 }
  0xb7   : > { %835 = vmatprep.subr.bf16.mxu0 %v834_v16  ;;  %v402_v16 = vrot.slane %v393_v7, %v1525_v52 }
  0xba   : > { %837 = vmatpush1.bf16.msra.mxu0 %v836_v21  ;;  %v429_v21 = vrot.slane %v420_v13, %v1525_v52 }
  0xbb   : > { %839 = vmatprep.subr.bf16.mxu0 %v838_v22 }
  0xbe   : > { %841 = vmatpush1.bf16.msra.mxu0 %v840_v27 }
  0xbf   : > { %843 = vmatprep.subr.bf16.mxu0 %v842_v28 }
  0xc2   : > { %845 = vmatpush1.bf16.msra.mxu0 %v844_v32 }
  0xc3   : > { %847 = vmatprep.subr.bf16.mxu0 %v846_v33 }
  0xc6   : > { %849 = vmatpush1.bf16.msra.mxu0 %v848_v38  ;;  %v456_v38 = vrot.slane %v447_v30, %v1525_v52 }
  0xc7   : > { %851 = vmatprep.subr.bf16.mxu0 %v850_v39 }
  0xca   : > { %853 = vmatpush1.bf16.msra.mxu0 %v852_v42 }
 0x109   : > { %v307_v43 = vpop.permute.xlu1 %306 }
 0x10a   : > { %v300_v48 = vpop.permute.xlu0 %299 }
 0x10b   : > { %v302_v2 = vmul.f32 %v300_v48, %v290_v59  ;;  %v303_v3 = vmul.f32 %v300_v48, %v294_v60 }
 0x10d   : > { %v309_v17 = vadd.f32 %v307_v43, %v302_v2  ;;  %v310_v18 = vadd.f32 %v307_v43, %v303_v3 }
 0x10e   : > { %v332_v44 = vpop.permute.xlu1 %331 }
 0x10f   : > { %v326_v56 = vpop.permute.xlu0 %325 }
 0x110   : > { %v328_v61 = vmul.f32 %v326_v56, %v317_v54  ;;  %v329_v62 = vmul.f32 %v326_v56, %v321_v55 }
 0x112   : > { %v334_v9 = vadd.f32 %v332_v44, %v328_v61  ;;  %v335_v10 = vadd.f32 %v332_v44, %v329_v62  ;;  %v479_v44 = vrot.slane %v474_v34, %v1523_v51 }
 0x113   : > { %v353_v46 = vpop.permute.xlu1 %352 }
 0x114   : > { %v359_v5 = vpop.permute.xlu0 %358  ;;  %v355_v11 = vmul.f32 %v353_v46, %v344_v63  ;;  %v356_v12 = vmul.f32 %v353_v46, %v348_v0  ;;  %v336_v23 = vmul.f32 %v334_v9, %v309_v17  ;;  %v337_v24 = vmul.f32 %v335_v10, %v310_v18 }
 0x116   : > { %v361_v25 = vadd.f32 %v359_v5, %v355_v11  ;;  %v362_v26 = vadd.f32 %v359_v5, %v356_v12 }
 0x118   : > { %v380_v50 = vpop.permute.xlu1 %379  ;;  %v363_v40 = vmul.f32 %v361_v25, %v336_v23  ;;  %v364_v41 = vmul.f32 %v362_v26, %v337_v24 }
 0x119   : > { %v407_v19 = vpop.permute.xlu0 %406  ;;  %v382_v27 = vmul.f32 %v380_v50, %v371_v14  ;;  %v383_v28 = vmul.f32 %v380_v50, %v375_v15 }
 0x11a   : > { %v409_v29 = vmul.f32 %v407_v19, %v398_v4  ;;  %v410_v1 = vmul.f32 %v407_v19, %v402_v16 }
 0x11c   : > { %v386_v58 = vpop.permute.xlu1 %385 }
 0x11d   : > { %v388_v31 = vadd.f32 %v386_v58, %v382_v27  ;;  %v389_v32 = vadd.f32 %v386_v58, %v383_v28 }
 0x11e   : > { %v440_v33 = vpop.permute.xlu0 %439 }
 0x11f   : > { %v390_v46 = vmul.f32 %v388_v31, %v363_v40  ;;  %v391_v47 = vmul.f32 %v389_v32, %v364_v41 }
 0x121   : > { %v413_v8 = vpop.permute.xlu1 %412 }
 0x122   : > { %v415_v42 = vadd.f32 %v413_v8, %v409_v29  ;;  %v416_v43 = vadd.f32 %v413_v8, %v410_v1 }
 0x123   : > { %v488_v48 = vpop.permute.xlu0 %487 }
 0x124   : > { %v417_v56 = vmul.f32 %v415_v42, %v390_v46  ;;  %v418_v57 = vmul.f32 %v416_v43, %v391_v47  ;;  %v490_v60 = vmul.f32 %v488_v48, %v479_v44  ;;  %v491_v61 = vmul.f32 %v488_v48, %v483_v45 }
 0x126   : > { %v434_v22 = vpop.permute.xlu1 %433 }
 0x127   : > { %v436_v35 = vmul.f32 %v434_v22, %v425_v20  ;;  %v437_v36 = vmul.f32 %v434_v22, %v429_v21 }
 0x129   : > { %v442_v49 = vadd.f32 %v440_v33, %v436_v35  ;;  %v443_v50 = vadd.f32 %v440_v33, %v437_v36 }
 0x12b   : > { %v461_v39 = vpop.permute.xlu1 %460  ;;  %v444_v62 = vmul.f32 %v442_v49, %v417_v56  ;;  %v445_v63 = vmul.f32 %v443_v50, %v418_v57 }
 0x12c   : > { %v463_v53 = vmul.f32 %v461_v39, %v452_v37  ;;  %v464_v54 = vmul.f32 %v461_v39, %v456_v38 }
 0x12f   : > { %v467_v55 = vpop.permute.xlu1 %466 }
 0x130   : > { %v469_v58 = vadd.f32 %v467_v55, %v463_v53  ;;  %v470_v59 = vadd.f32 %v467_v55, %v464_v54 }
 0x132   : > { %v471_v52 = vmul.f32 %v469_v58, %v444_v62  ;;  %v472_v3 = vmul.f32 %v470_v59, %v445_v63 }
 0x134   : > { %v494_v51 = vpop.permute.xlu1 %493 }
 0x135   : > { %v496_v0 = vadd.f32 %v494_v51, %v490_v60  ;;  %v497_v2 = vadd.f32 %v494_v51, %v491_v61 }
 0x137   : > { %v498_v5 = vmul.f32 %v496_v0, %v471_v52  ;;  %v499_v6 = vmul.f32 %v497_v2, %v472_v3 }
 0x139   : > { %628 = vmatprep.mubr.f32.mxu0 %v499_v6 }
 0x13a   : > { %629 = vmatmul.mubr.f32.vlgmr.msra.gmra.mrb[0].mxu0 %v498_v5 }
 0x20d   : > { %v630_v7 = vpop.f32.mrb[0].mxu0 }
 0x20e   : > { %v634_v8 = vmul.f32 %v630_v7, %v630_v7  ;;  %v632_v9 = vpop.f32.mrb[1].mxu0 }
 0x210   : > { %635 = vmax.xlane.f32.xlu1 %v634_v8 }
 0x29d   : > { %v636_v10 = vpop.xlane.xlu1 %635 }
 0x29e   : > { %971 = vrcp.f32 %v636_v10 }
 0x2a8   : > { %v972_v11 = vpop.eup %971 }
 0x2a9   : > { %v638_v12 = vmul.f32 %v972_v11, %v634_v8 }
 0x2ab   : > { %639 = vst [vmem:[%s281_s22] sm:$0xff] %v638_v12 }
 0x2ac   : > { %1100 = shalt.err (!%p1097_p5)
}
 0x2ad   : > { %s1101_s7 = scalar_lea.hbm %s1548_s5, 128  ;;  %s1105_s24 = scalar_lea.hbm %s1600_s4, 1024 }
 0x2ae   : > { %p1102_p9 = scmp.ne.s32.totalorder %s1548_s5, %s1101_s7  ;;  %p1106_p3 = scmp.lt.u32.totalorder %s1548_s5, %s1600_s4 }
 0x2af   : > { %p1107_p7 = scmp.lt.u32.totalorder %s1105_s24, %s1101_s7  ;;  %p1109_p13 = scmp.lt.u32.totalorder %s1101_s7, %s1548_s5 }
 0x2b0   : > { %p1103_p12 = pnand %p1102_p9, %p1362_p2 }
 0x2b1   : > { %p1108_p10 = por %p1107_p7, %p1106_p3 }
 0x2b2   : > { %p1104_p11 = pneg %p1103_p12 }
 0x2b3   : > { %p1110_p1 = por %p1109_p13, %p1108_p10 }
 0x2b5   : > { %p1111_p4 = pnand %p1110_p1, %p1104_p11 }
 0x2b7   : > { %1114 = shalt.err (!%p1111_p4)
}
 0x2b8   : > { %868 = dma.vmem_to_hbm [thread:$0]  (%p1362_p2), %s1550_s6, 128, %s1548_s5, %s641_s12  }
 0x2b9 PF: > { %p895_p6 = scmp.ge.s32.totalorder %s1177_s20, 2  ;;  %s667_s25 = sand.u32 1, %s1157_s15  }
 0x2ba   : > { %p1618_p8 = scmp.ne.s32.totalorder %s1608_s26, 0  ;;  %s668_s22 = scalar_lea.sflag [#allocation4], %s667_s25 }
 0x2bc   : > { %p885_p0 = pnand %p895_p6, %p1618_p8 }
 0x2be   : > { %1152 = dma.done.wait (!%p885_p0), %s668_s22, 128  }
 0x2bf   : > { %1154 = vsyncadd (!%p885_p0), %s668_s22, 4294967168  ;;  %s22_s20 = sadd.s32 1, %s1177_s20   ;;  %s1619_s15 = smov %s1161_s16 }
 0x2c0   : > { %p19_p5 = scmp.ge.s32.totalorder %s22_s20, 10   ;;  %s1620_s16 = smov %s1165_s17 }
 0x2c1   : > { %s1621_s17 = smov %s1374_s10  ;;  %s1622_s18 = smov %s1173_s19 }
 0x2c2   : > { %s1623_s19 = smov %s1625_s28  ;;  %21 = sbr.rel (!%p19_p5) target bundleno = 8 (0x8), region = 103 }
 0x2c9   :  { %673 = vsyncpa [#allocation3], 1 }
 0x2ca   :  { %675 = vsyncpa [#allocation3 + $0x1], 1 }
 0x2cb   :  { %676 = vsyncpa [#allocation6], 1 }
 0x2cc   :  { %677 = vsyncpa [#allocation9], 1 }
 0x2cd   :  { %679 = vsyncpa [#allocation9 + $0x1], 1 }
 0x2ce   :  { %680 = vsyncpa [#allocation4], 1 }
 0x2cf   :  { %682 = vsyncpa [#allocation4 + $0x1], 1 }

</bundles_post_ra>
